<compile_context>
chip_gen: v7x
topology: tpu7x:2x2x1
jax: 0.10.0
libtpu: 0.0.40
codegen_flags: <defaults>
</compile_context>

<pallas_src>
import functools

import jax
import jax.numpy as jnp
from jax.experimental import pallas as pl
from jax.experimental.pallas import tpu as pltpu

HIDDEN = 196       # nn.Linear(in_features, 196)
HID_PAD = 256      # hidden padded to a full lane multiple
H2 = 2 * HID_PAD   # both heads concatenated: 512
OUT_PAD = 128      # fused lane-dense output width


def _round_up(a: int, b: int) -> int:
    return (a + b - 1) // b * b


def _make_kernel(in_pad: int):
    """Kernel factory; in_pad (padded observation dim) is a static closure."""

    def kernel(x_ref, w_ref, b_ref, out_ref):
        x = x_ref[...]                                          # (TN, in_pad)

        # Static slices into the packed weight slab (all sublane offsets are
        # multiples of 8, lane slice [0:128) is tile-aligned).
        w1 = w_ref[0:in_pad, :]                                 # (in_pad, 512)
        w2 = w_ref[in_pad:in_pad + H2, :]                       # (512, 512)
        w3 = w_ref[in_pad + H2:in_pad + 2 * H2, 0:OUT_PAD]      # (512, 128)

        b = b_ref[...]                                          # (3, 512)
        b1 = b[0:1, :]
        b2 = b[1:2, :]
        b3 = b[2:3, 0:OUT_PAD]

        # Fused two-head MLP: 3 MXU matmuls, all lane-dense.
        hv = jnp.dot(x, w1, preferred_element_type=jnp.float32) + b1
        hv = jnp.maximum(hv, 0.0)
        hv = jnp.dot(hv, w2, preferred_element_type=jnp.float32) + b2
        hv = jnp.maximum(hv, 0.0)
        out = jnp.dot(hv, w3, preferred_element_type=jnp.float32) + b3

        out_ref[...] = out.astype(out_ref.dtype)                # (TN, 128) unmasked store

    return kernel


def pack_params(p, in_features: int, out_actions: int):
    """Pack the 12 per-layer tensors into one weight slab + one bias slab.

    Zero padding is numerically exact: ReLU(0) = 0 and zero rows/cols of the
    block-structured weights contribute nothing to the real lanes.
    """
    assert out_actions + 1 <= OUT_PAD, "out_actions + 1 must fit in 128 lanes"
    in_pad = _round_up(in_features, 8)
    A = out_actions

    # Layer 1: [wp1 | wv1] -> (in_pad, 512); policy in lanes [0,196), value in [256,452).
    w1 = jnp.zeros((in_pad, H2), jnp.float32)
    w1 = w1.at[:in_features, :HIDDEN].set(p["wp1"])
    w1 = w1.at[:in_features, HID_PAD:HID_PAD + HIDDEN].set(p["wv1"])

    # Layer 2: block-diagonal (512, 512).
    w2 = jnp.zeros((H2, H2), jnp.float32)
    w2 = w2.at[:HIDDEN, :HIDDEN].set(p["wp2"])
    w2 = w2.at[HID_PAD:HID_PAD + HIDDEN, HID_PAD:HID_PAD + HIDDEN].set(p["wv2"])

    # Layer 3: stacked (512, 512) but only the first 128 lanes are used;
    # policy scores land in lanes [0, A), the state value in lane A.
    w3 = jnp.zeros((H2, H2), jnp.float32)
    w3 = w3.at[:HIDDEN, :A].set(p["wp3"])
    w3 = w3.at[HID_PAD:HID_PAD + HIDDEN, A:A + 1].set(p["wv3"])

    w_slab = jnp.concatenate([w1, w2, w3], axis=0)              # (in_pad + 1024, 512)

    b_slab = jnp.zeros((3, H2), jnp.float32)
    b_slab = b_slab.at[0, :HIDDEN].set(p["bp1"][0])
    b_slab = b_slab.at[0, HID_PAD:HID_PAD + HIDDEN].set(p["bv1"][0])
    b_slab = b_slab.at[1, :HIDDEN].set(p["bp2"][0])
    b_slab = b_slab.at[1, HID_PAD:HID_PAD + HIDDEN].set(p["bv2"][0])
    b_slab = b_slab.at[2, :A].set(p["bp3"][0])
    b_slab = b_slab.at[2, A].set(p["bv3"][0, 0])

    return {"w": w_slab, "b": b_slab, "in_pad": in_pad,
            "in_features": in_features, "out_actions": out_actions}


def aac_policy_net_forward(x, packed):
    """x: (N, O) float32. Returns (action_scores (N, A), state_values (N, 1))."""
    n, in_features = x.shape
    assert in_features == packed["in_features"]
    in_pad = packed["in_pad"]
    out_actions = packed["out_actions"]
    w_slab, b_slab = packed["w"], packed["b"]
    w_rows = w_slab.shape[0]

    # Batch tiling: pad N to a multiple of the batch tile so every block is full.
    tile_n = 256 if n >= 256 else _round_up(n, 8)
    n_pad = _round_up(n, tile_n)

    x_p = jnp.zeros((n_pad, in_pad), jnp.float32)
    x_p = x_p.at[:n, :in_features].set(x.astype(jnp.float32))

    out = pl.pallas_call(
        _make_kernel(in_pad),
        out_shape=jax.ShapeDtypeStruct((n_pad, OUT_PAD), jnp.float32),
        grid_spec=pltpu.PrefetchScalarGridSpec(
            num_scalar_prefetch=0,
            grid=(n_pad // tile_n,),
            in_specs=[
                pl.BlockSpec((tile_n, in_pad), lambda i: (i, 0)),   # x tile
                pl.BlockSpec((w_rows, H2), lambda i: (0, 0)),       # weight slab (resident)
                pl.BlockSpec((3, H2), lambda i: (0, 0)),            # bias slab (resident)
            ],
            out_specs=pl.BlockSpec((tile_n, OUT_PAD), lambda i: (i, 0)),
        ),
        compiler_params=pltpu.CompilerParams(
            dimension_semantics=("parallel",),
        ),
    )(x_p, w_slab, b_slab)

    action_scores = out[:n, :out_actions]
    state_values = out[:n, out_actions:out_actions + 1]
    return action_scores, state_values


def init_params(key, in_features, out_actions):
    """Deterministic synthetic init (PyTorch-style uniform bounds), weights as (in, out)."""
    def linear(k, fan_in, fan_out):
        kw, kb = jax.random.split(k)
        bound = 1.0 / jnp.sqrt(fan_in)
        w = jax.random.uniform(kw, (fan_in, fan_out), jnp.float32, -bound, bound)
        b = jax.random.uniform(kb, (1, fan_out), jnp.float32, -bound, bound)
        return w, b

    keys = jax.random.split(key, 6)
    wp1, bp1 = linear(keys[0], in_features, HIDDEN)
    wp2, bp2 = linear(keys[1], HIDDEN, HIDDEN)
    wp3, bp3 = linear(keys[2], HIDDEN, out_actions)
    wv1, bv1 = linear(keys[3], in_features, HIDDEN)
    wv2, bv2 = linear(keys[4], HIDDEN, HIDDEN)
    wv3, bv3 = linear(keys[5], HIDDEN, 1)
    return dict(wp1=wp1, bp1=bp1, wp2=wp2, bp2=bp2, wp3=wp3, bp3=bp3,
                wv1=wv1, bv1=bv1, wv2=wv2, bv2=bv2, wv3=wv3, bv3=bv3)


def reference_forward(x, p):
    relu = lambda a: jnp.maximum(a, 0.0)
    h = relu(x @ p["wp1"] + p["bp1"])
    h = relu(h @ p["wp2"] + p["bp2"])
    act = h @ p["wp3"] + p["bp3"]
    v = relu(x @ p["wv1"] + p["bv1"])
    v = relu(v @ p["wv2"] + p["bv2"])
    sv = v @ p["wv3"] + p["bv3"]
    return act, sv


if __name__ == "__main__":
    key = jax.random.PRNGKey(0)
    k_x, k_p = jax.random.split(key)

    N = 8            # batch of observations
    IN_FEATURES = 8  # observation dimension
    OUT_ACTIONS = 4  # number of actions

    x = jax.random.normal(k_x, (N, IN_FEATURES), dtype=jnp.float32)
    params = init_params(k_p, IN_FEATURES, OUT_ACTIONS)
    packed = pack_params(params, IN_FEATURES, OUT_ACTIONS)

    act, sv = aac_policy_net_forward(x, packed)
    act = jax.block_until_ready(act)
    sv = jax.block_until_ready(sv)

    act_ref, sv_ref = reference_forward(x, params)
    assert act.shape == (N, OUT_ACTIONS) and sv.shape == (N, 1)
    assert jnp.allclose(act, act_ref, atol=1e-5, rtol=1e-5)
    assert jnp.allclose(sv, sv_ref, atol=1e-5, rtol=1e-5)

    print("KERNEL_OK")
</pallas_src>

<mosaic_0001>
module attributes {stable_mosaic.version = 11 : i64} {
  func.func @kernel(%arg0: i32, %arg1: memref<8x8xf32, #tpu.memory_space<vmem>>, %arg2: memref<1032x512xf32, #tpu.memory_space<vmem>>, %arg3: memref<3x512xf32, #tpu.memory_space<vmem>>, %arg4: memref<8x128xf32, #tpu.memory_space<vmem>>) attributes {dimension_semantics = [#tpu.dimension_semantics<parallel>], iteration_bounds = array<i64: 1>, scalar_prefetch = 0 : i64, scratch_operands = 0 : i64, tpu.core_type = #tpu.core_type<tc>, window_params = [{transform_indices = @transform_0, window_bounds = array<i64: 8, 8>}, {pipeline_mode = #tpu.pipeline_mode<synchronous>, transform_indices = @transform_1, window_bounds = array<i64: 1032, 512>}, {pipeline_mode = #tpu.pipeline_mode<synchronous>, transform_indices = @transform_2, window_bounds = array<i64: 3, 512>}, {transform_indices = @transform_3, window_bounds = array<i64: 8, 128>}]} {
    %c0 = arith.constant 0 : index
    %c0_0 = arith.constant 0 : index
    %0 = vector.load %arg1[%c0, %c0_0] : memref<8x8xf32, #tpu.memory_space<vmem>>, vector<8x8xf32>
    %c0_1 = arith.constant 0 : index
    %c0_2 = arith.constant 0 : index
    %1 = vector.load %arg2[%c0_1, %c0_2] : memref<1032x512xf32, #tpu.memory_space<vmem>>, vector<8x512xf32>
    %c8 = arith.constant 8 : index
    %c0_3 = arith.constant 0 : index
    %2 = vector.load %arg2[%c8, %c0_3] : memref<1032x512xf32, #tpu.memory_space<vmem>>, vector<512x512xf32>
    %c520 = arith.constant 520 : index
    %c0_4 = arith.constant 0 : index
    %3 = vector.load %arg2[%c520, %c0_4] : memref<1032x512xf32, #tpu.memory_space<vmem>>, vector<512x128xf32>
    %c0_5 = arith.constant 0 : index
    %c0_6 = arith.constant 0 : index
    %4 = vector.load %arg3[%c0_5, %c0_6] : memref<3x512xf32, #tpu.memory_space<vmem>>, vector<3x512xf32>
    %5 = vector.extract_strided_slice %4 {offsets = [0, 0], sizes = [1, 512], strides = [1, 1]} : vector<3x512xf32> to vector<1x512xf32>
    %6 = vector.extract_strided_slice %4 {offsets = [1, 0], sizes = [1, 512], strides = [1, 1]} : vector<3x512xf32> to vector<1x512xf32>
    %7 = vector.extract_strided_slice %4 {offsets = [2, 0], sizes = [1, 128], strides = [1, 1]} : vector<3x512xf32> to vector<1x128xf32>
    %cst = arith.constant dense<0.000000e+00> : vector<8x512xf32>
    %8 = tpu.matmul %0, %1, %cst {dimension_numbers = #tpu.dot_dimension_numbers<[1], [0], [0], [1], [0, 0, 1, 1], [], []>} : vector<8x8xf32>, vector<8x512xf32>, vector<8x512xf32> -> vector<8x512xf32>
    %9 = vector.broadcast %5 : vector<1x512xf32> to vector<8x512xf32>
    %10 = arith.addf %8, %9 : vector<8x512xf32>
    %cst_7 = arith.constant 0.000000e+00 : f32
    %11 = vector.broadcast %cst_7 : f32 to vector<8x512xf32>
    %12 = arith.maximumf %10, %11 : vector<8x512xf32>
    %cst_8 = arith.constant dense<0.000000e+00> : vector<8x512xf32>
    %13 = tpu.matmul %12, %2, %cst_8 {dimension_numbers = #tpu.dot_dimension_numbers<[1], [0], [0], [1], [0, 0, 1, 1], [], []>} : vector<8x512xf32>, vector<512x512xf32>, vector<8x512xf32> -> vector<8x512xf32>
    %14 = vector.broadcast %6 : vector<1x512xf32> to vector<8x512xf32>
    %15 = arith.addf %13, %14 : vector<8x512xf32>
    %cst_9 = arith.constant 0.000000e+00 : f32
    %16 = vector.broadcast %cst_9 : f32 to vector<8x512xf32>
    %17 = arith.maximumf %15, %16 : vector<8x512xf32>
    %cst_10 = arith.constant dense<0.000000e+00> : vector<8x128xf32>
    %18 = tpu.matmul %17, %3, %cst_10 {dimension_numbers = #tpu.dot_dimension_numbers<[1], [0], [0], [1], [0, 0, 1, 1], [], []>} : vector<8x512xf32>, vector<512x128xf32>, vector<8x128xf32> -> vector<8x128xf32>
    %19 = vector.broadcast %7 : vector<1x128xf32> to vector<8x128xf32>
    %20 = arith.addf %18, %19 : vector<8x128xf32>
    %c0_11 = arith.constant 0 : index
    %c0_12 = arith.constant 0 : index
    %21 = vector.load %arg4[%c0_11, %c0_12] : memref<8x128xf32, #tpu.memory_space<vmem>>, vector<8x128xf32>
    tpu.vector_store %arg4[%c0_11, %c0_12], %20 {strides = array<i32>} : memref<8x128xf32, #tpu.memory_space<vmem>>, vector<8x128xf32>,
    return
  }
  func.func @transform_0(%arg0: i32) -> (i32, i32) {
    %c0_i32 = arith.constant 0 : i32
    %c0_i32_0 = arith.constant 0 : i32
    return %arg0, %c0_i32 : i32, i32
  }
  func.func @transform_1(%arg0: i32) -> (i32, i32) {
    %c0_i32 = arith.constant 0 : i32
    %c0_i32_0 = arith.constant 0 : i32
    %c0_i32_1 = arith.constant 0 : i32
    return %c0_i32, %c0_i32_0 : i32, i32
  }
  func.func @transform_2(%arg0: i32) -> (i32, i32) {
    %c0_i32 = arith.constant 0 : i32
    %c0_i32_0 = arith.constant 0 : i32
    %c0_i32_1 = arith.constant 0 : i32
    return %c0_i32, %c0_i32_0 : i32, i32
  }
  func.func @transform_3(%arg0: i32) -> (i32, i32) {
    %c0_i32 = arith.constant 0 : i32
    %c0_i32_0 = arith.constant 0 : i32
    return %arg0, %c0_i32 : i32, i32
  }
}

</mosaic_0001>

<bundles_post_ra>
// kernel: tpu_custom_call.1
= control target key start
LH: loop header
LB: loop body
LE: loop exit
PB: predicated region body
PF: predicated region fallthrough
CT: control target
= control target key end

     0   :  { %8 = vsyncpa [#allocation3], 0  ;;  %s1661_s0 = inlined_call_operand.hbm [shape: f32[8,8], index: 0, kind: input, shape index: {}]   ;;  %s1662_s1 = inlined_call_operand.hbm [shape: f32[1032,512], index: 1, kind: input, shape index: {}]   ;;  %s1663_s2 = inlined_call_operand.hbm [shape: f32[3,512], index: 2, kind: input, shape index: {}]   ;;  %s1664_s3 = inlined_call_operand.hbm [shape: f32[8,128], index: 3, kind: output, shape index: {}]  }
   0x1   :  { %9 = vsyncpa [#allocation6], 0 }
   0x2   :  { %10 = vsyncpa [#allocation4], 0  ;;  %s1553_s12 = smov [#allocation5]   ;;  %s1459_s16 = scalar_lea.hbm %s1662_s1, 66048 }
   0x3   :  { %s26_s13 = sshll.u32 %s1553_s12, 4  ;;  %p1460_p0 = scmp.ne.s32.totalorder %s1662_s1, %s1459_s16  ;;  %s27_s13 = int_to_ptr.vmem [resolvable:$true] %s26_s13 }
   0x4   :  { %p1463_p1 = scmp.lt.u32.totalorder %s1459_s16, %s1662_s1 }
   0x6   :  { %p1465_p2 = pnand %p1463_p1, %p1460_p0 }
   0x8   :  { %1468 = shalt.err (!%p1465_p2)
}
   0x9   :  { %s1469_s21 = scalar_lea.vmem %s27_s13, 66048  ;;  %p1474_p4 = scmp.lt.s32.totalorder %s27_s13, %s27_s13 }
   0xa   :  { %p1470_p3 = scmp.ne.s32.totalorder %s27_s13, %s1469_s21  ;;  %p1475_p5 = scmp.lt.s32.totalorder %s1469_s21, %s1469_s21 }
   0xc   :  { %p1476_p6 = por %p1475_p5, %p1474_p4 }
   0xe   :  { %p1477_p7 = pnand %p1476_p6, %p1470_p3 }
  0x10   :  { %1480 = shalt.err (!%p1477_p7)
}
  0x11   :  { %s1554_s22 = smov 512   ;;  %s1555_s23 = smov 32  }
  0x12   :  { %32 = dma.hbm_to_vmem [thread:$0]  %s1662_s1, 66048, %s27_s13, [#allocation6], %s1554_s22, %s1554_s22, %s1555_s23  }
  0x13   :  { %s1556_s26 = smov [#allocation2]   ;;  %s1557_s28 = smov [#allocation7]  }
  0x14   :  { %s17_s27 = sshll.u32 %s1556_s26, 4  ;;  %s39_s29 = sshll.u32 %s1557_s28, 4  ;;  %s18_s27 = int_to_ptr.vmem [resolvable:$true] %s17_s27  ;;  %s40_s29 = int_to_ptr.vmem [resolvable:$true] %s39_s29 }
  0x15   :  { %s1481_s5 = scalar_lea.hbm %s1661_s0, 128 }
  0x16   :  { %p1482_p8 = scmp.ne.s32.totalorder %s1661_s0, %s1481_s5  ;;  %p1485_p9 = scmp.lt.u32.totalorder %s1481_s5, %s1661_s0 }
  0x18   :  { %p1487_p10 = pnand %p1485_p9, %p1482_p8 }
  0x1a   :  { %1490 = shalt.err (!%p1487_p10)
}
  0x1b   :  { %s1491_s1 = scalar_lea.vmem %s18_s27, 128  ;;  %p1496_p12 = scmp.lt.s32.totalorder %s18_s27, %s18_s27 }
  0x1c   :  { %p1492_p11 = scmp.ne.s32.totalorder %s18_s27, %s1491_s1  ;;  %p1497_p13 = scmp.lt.s32.totalorder %s1491_s1, %s1491_s1 }
  0x1e   :  { %p1498_p0 = por %p1497_p13, %p1496_p12 }
  0x20   :  { %p1499_p1 = pnand %p1498_p0, %p1492_p11 }
  0x22   :  { %1502 = shalt.err (!%p1499_p1)
}
  0x23   :  { %20 = dma.hbm_to_vmem [thread:$0]  %s1661_s0, 128, %s18_s27, [#allocation3]  }
  0x24   :  { %s1503_s14 = scalar_lea.hbm %s1663_s2, 256 }
  0x25   :  { %p1504_p2 = scmp.ne.s32.totalorder %s1663_s2, %s1503_s14  ;;  %p1507_p3 = scmp.lt.u32.totalorder %s1503_s14, %s1663_s2 }
  0x27   :  { %p1509_p4 = pnand %p1507_p3, %p1504_p2 }
  0x29   :  { %1512 = shalt.err (!%p1509_p4)
}
  0x2a   :  { %s1513_s19 = scalar_lea.vmem %s40_s29, 256  ;;  %p1518_p6 = scmp.lt.s32.totalorder %s40_s29, %s40_s29 }
  0x2b   :  { %p1514_p5 = scmp.ne.s32.totalorder %s40_s29, %s1513_s19  ;;  %p1519_p7 = scmp.lt.s32.totalorder %s1513_s19, %s1513_s19 }
  0x2d   :  { %p1520_p8 = por %p1519_p7, %p1518_p6 }
  0x2f   :  { %p1521_p9 = pnand %p1520_p8, %p1514_p5 }
  0x31   :  { %1524 = shalt.err (!%p1521_p9)
}
  0x32   :  { %42 = dma.hbm_to_vmem [thread:$0]  %s1663_s2, 256, %s40_s29, [#allocation6]  }
  0x33   :  { %1547 = dma.done.wait [#allocation3], 128  }
  0x34   :  { %1548 = vsyncadd [#allocation3], 4294967168 }
  0x35   :  { %1549 = dma.done.wait [#allocation6], 66304  }
  0x36   :  { %1550 = vsyncadd [#allocation6], 4294900992  ;;  %v1558_v0 = vmov 0.0   ;;  %v54_v1 = vld [vmem:[#allocation5 + $0x8] sm:$0xff]  ;;  %v53_v2 = vld [vmem:[#allocation5] sm:$0xff]  ;;  %vm417_vm0 = vcmask 64512  }
  0x37   :  { %485 = vmatprep.mubr.f32.mxu0 %v1558_v0  ;;  %556 = vmatprep.mubr.f32.mxu1 %v1558_v0  ;;  %v52_v3 = vld [vmem:[#allocation2] sm:$0xff]  ;;  %v55_v5 = vld [vmem:[#allocation5 + $0x10] sm:$0xff]  ;;  %v58_v6 = vld [vmem:[#allocation5 + $0x28] sm:$0xff]  ;;  %s1559_s2 = smov [#allocation8]  }
  0x38   :  { %421 = vmatprep.subr.mxu0 %v54_v1  ;;  %v56_v4 = vld [vmem:[#allocation5 + $0x18] sm:$0xff]  ;;  %v62_v7 = vld [vmem:[#allocation5 + $0x48] sm:$0xff]  ;;  %v57_v12 = vld [vmem:[#allocation5 + $0x20] sm:$0xff]  ;;  %s1042_s21 = sshll.u32 %s1559_s2, 4  ;;  %s1043_s21 = int_to_ptr.vmem [resolvable:$true] %s1042_s21 }
  0x39   :  { %422 = vmatpush1.msra.mxu0 %v53_v2  ;;  %492 = vmatprep.subr.mxu1 %v56_v4  ;;  %v60_v8 = vld [vmem:[#allocation5 + $0x38] sm:$0xff]  ;;  %v1124_v10 = vpack.c.bf16 %v62_v7, %v58_v6  ;;  %v61_v13 = vld [vmem:[#allocation5 + $0x40] sm:$0xff]  ;;  %v59_v14 = vld [vmem:[#allocation5 + $0x30] sm:$0xff]  ;;  %s1525_s22 = scalar_lea.vmem %s1043_s21, 128  ;;  %p1530_p11 = scmp.lt.s32.totalorder %s1043_s21, %s1043_s21 }
  0x3a   :  { %v64_v9 = vld [vmem:[#allocation5 + $0x58] sm:$0xff]  ;;  %1052 = vmatmul.mubr.msk.f32.vlgmr.msra.gmra.mrb[0].mxu0 %vm417_vm0, %v52_v3  ;;  %493 = vmatpush1.msra.mxu1 %v55_v5  ;;  %v1126_v15 = vpack.c.bf16 %v61_v13, %v57_v12  ;;  %v63_v16 = vld [vmem:[#allocation5 + $0x50] sm:$0xff]  ;;  %v66_v17 = vld [vmem:[#allocation5 + $0x68] sm:$0xff]  ;;  %p1526_p10 = scmp.ne.s32.totalorder %s1043_s21, %s1525_s22  ;;  %p1531_p12 = scmp.lt.s32.totalorder %s1525_s22, %s1525_s22 }
  0x3b   :  { %v1252_v11 = vpack.c.bf16 %v64_v9, %v60_v8  ;;  %1053 = vmatmul.mubr.msk.f32.vlgmr.msra.gmra.mrb[0].mxu1 %vm417_vm0, %v52_v3  ;;  %v70_v18 = vld [vmem:[#allocation5 + $0x88] sm:$0xff]  ;;  %1125 = vmatprep.subr.bf16.mxu0 %v1124_v10  ;;  %v1254_v19 = vpack.c.bf16 %v63_v16, %v59_v14  ;;  %v68_v21 = vld [vmem:[#allocation5 + $0x78] sm:$0xff]  ;;  %v65_v23 = vld [vmem:[#allocation5 + $0x60] sm:$0xff] }
  0x3c   :  { %v1128_v20 = vpack.c.bf16 %v70_v18, %v66_v17  ;;  %v72_v22 = vld [vmem:[#allocation5 + $0x98] sm:$0xff]  ;;  %1127 = vmatpush1.bf16.msra.mxu0 %v1126_v15  ;;  %v69_v25 = vld [vmem:[#allocation5 + $0x80] sm:$0xff]  ;;  %v67_v26 = vld [vmem:[#allocation5 + $0x70] sm:$0xff]  ;;  %p1532_p13 = por %p1531_p12, %p1530_p11 }
  0x3d   :  { %1253 = vmatprep.subr.bf16.mxu1 %v1252_v11  ;;  %v1256_v24 = vpack.c.bf16 %v72_v22, %v68_v21  ;;  %v71_v27 = vld [vmem:[#allocation5 + $0x90] sm:$0xff]  ;;  %v1130_v28 = vpack.c.bf16 %v69_v25, %v65_v23  ;;  %v74_v30 = vld [vmem:[#allocation5 + $0xa8] sm:$0xff]  ;;  %v76_v32 = vld [vmem:[#allocation5 + $0xb8] sm:$0xff] }
  0x3e   :  { %1255 = vmatpush1.bf16.msra.mxu1 %v1254_v19  ;;  %1129 = vmatprep.subr.bf16.mxu0 %v1128_v20  ;;  %v1258_v29 = vpack.c.bf16 %v71_v27, %v67_v26  ;;  %v78_v31 = vld [vmem:[#allocation5 + $0xc8] sm:$0xff]  ;;  %v80_v34 = vld [vmem:[#allocation5 + $0xd8] sm:$0xff]  ;;  %v73_v35 = vld [vmem:[#allocation5 + $0xa0] sm:$0xff]  ;;  %p1533_p0 = pnand %p1532_p13, %p1526_p10 }
  0x3f   :  { %1257 = vmatprep.subr.bf16.mxu1 %v1256_v24  ;;  %v1132_v33 = vpack.c.bf16 %v78_v31, %v74_v30  ;;  %v77_v36 = vld [vmem:[#allocation5 + $0xc0] sm:$0xff]  ;;  %v1260_v37 = vpack.c.bf16 %v80_v34, %v76_v32  ;;  %v75_v38 = vld [vmem:[#allocation5 + $0xb0] sm:$0xff]  ;;  %v82_v40 = vld [vmem:[#allocation5 + $0xe8] sm:$0xff] }
  0x40   :  { %v79_v39 = vld [vmem:[#allocation5 + $0xd0] sm:$0xff]  ;;  %1131 = vmatpush1.bf16.msra.mxu0 %v1130_v28  ;;  %v1134_v41 = vpack.c.bf16 %v77_v36, %v73_v35  ;;  %v86_v42 = vld [vmem:[#allocation5 + $0x108] sm:$0xff]  ;;  %v84_v43 = vld [vmem:[#allocation5 + $0xf8] sm:$0xff] }
  0x41   :  { %v88_v44 = vld [vmem:[#allocation5 + $0x118] sm:$0xff]  ;;  %1133 = vmatprep.subr.bf16.mxu0 %v1132_v33  ;;  %v1262_v45 = vpack.c.bf16 %v79_v39, %v75_v38  ;;  %v1136_v46 = vpack.c.bf16 %v86_v42, %v82_v40  ;;  %v81_v47 = vld [vmem:[#allocation5 + $0xe0] sm:$0xff]  ;;  %v83_v49 = vld [vmem:[#allocation5 + $0xf0] sm:$0xff] }
  0x42   :  { %1259 = vmatpush1.bf16.msra.mxu1 %v1258_v29  ;;  %v85_v48 = vld [vmem:[#allocation5 + $0x100] sm:$0xff]  ;;  %v1264_v50 = vpack.c.bf16 %v88_v44, %v84_v43  ;;  %v87_v51 = vld [vmem:[#allocation5 + $0x110] sm:$0xff]  ;;  %v90_v52 = vld [vmem:[#allocation5 + $0x128] sm:$0xff] }
  0x43   :  { %1261 = vmatprep.subr.bf16.mxu1 %v1260_v37  ;;  %v94_v53 = vld [vmem:[#allocation5 + $0x148] sm:$0xff]  ;;  %v92_v54 = vld [vmem:[#allocation5 + $0x138] sm:$0xff]  ;;  %v1138_v56 = vpack.c.bf16 %v85_v48, %v81_v47  ;;  %v1266_v57 = vpack.c.bf16 %v87_v51, %v83_v49  ;;  %v89_v59 = vld [vmem:[#allocation5 + $0x120] sm:$0xff] }
  0x44   :  { %v96_v55 = vld [vmem:[#allocation5 + $0x158] sm:$0xff]  ;;  %1135 = vmatpush1.bf16.msra.mxu0 %v1134_v41  ;;  %v1140_v58 = vpack.c.bf16 %v94_v53, %v90_v52  ;;  %v93_v60 = vld [vmem:[#allocation5 + $0x140] sm:$0xff]  ;;  %v91_v61 = vld [vmem:[#allocation5 + $0x130] sm:$0xff] }
  0x45   :  { %1137 = vmatprep.subr.bf16.mxu0 %v1136_v46  ;;  %v1268_v62 = vpack.c.bf16 %v96_v55, %v92_v54  ;;  %v95_v63 = vld [vmem:[#allocation5 + $0x150] sm:$0xff]  ;;  %v98_v0 = vld [vmem:[#allocation5 + $0x168] sm:$0xff]  ;;  %v100_v2 = vld [vmem:[#allocation5 + $0x178] sm:$0xff]  ;;  %v1142_v4 = vpack.c.bf16 %v93_v60, %v89_v59 }
  0x46   :  { %1263 = vmatpush1.bf16.msra.mxu1 %v1262_v45  ;;  %v102_v1 = vld [vmem:[#allocation5 + $0x188] sm:$0xff]  ;;  %v104_v3 = vld [vmem:[#allocation5 + $0x198] sm:$0xff]  ;;  %v1270_v5 = vpack.c.bf16 %v95_v63, %v91_v61  ;;  %v97_v7 = vld [vmem:[#allocation5 + $0x160] sm:$0xff] }
  0x47   :  { %1265 = vmatprep.subr.bf16.mxu1 %v1264_v50  ;;  %v1144_v6 = vpack.c.bf16 %v102_v1, %v98_v0  ;;  %v101_v8 = vld [vmem:[#allocation5 + $0x180] sm:$0xff]  ;;  %v99_v9 = vld [vmem:[#allocation5 + $0x170] sm:$0xff]  ;;  %v1272_v10 = vpack.c.bf16 %v104_v3, %v100_v2  ;;  %v106_v12 = vld [vmem:[#allocation5 + $0x1a8] sm:$0xff] }
  0x48   :  { %1139 = vmatpush1.bf16.msra.mxu0 %v1138_v56  ;;  %v103_v11 = vld [vmem:[#allocation5 + $0x190] sm:$0xff]  ;;  %v110_v13 = vld [vmem:[#allocation5 + $0x1c8] sm:$0xff]  ;;  %v108_v14 = vld [vmem:[#allocation5 + $0x1b8] sm:$0xff]  ;;  %v1146_v16 = vpack.c.bf16 %v101_v8, %v97_v7 }
  0x49   :  { %1141 = vmatprep.subr.bf16.mxu0 %v1140_v58  ;;  %v112_v15 = vld [vmem:[#allocation5 + $0x1d8] sm:$0xff]  ;;  %v1274_v17 = vpack.c.bf16 %v103_v11, %v99_v9  ;;  %v1148_v18 = vpack.c.bf16 %v110_v13, %v106_v12  ;;  %v105_v19 = vld [vmem:[#allocation5 + $0x1a0] sm:$0xff]  ;;  %v107_v21 = vld [vmem:[#allocation5 + $0x1b0] sm:$0xff] }
  0x4a   :  { %1267 = vmatpush1.bf16.msra.mxu1 %v1266_v57  ;;  %v109_v20 = vld [vmem:[#allocation5 + $0x1c0] sm:$0xff]  ;;  %v1276_v22 = vpack.c.bf16 %v112_v15, %v108_v14  ;;  %v111_v23 = vld [vmem:[#allocation5 + $0x1d0] sm:$0xff]  ;;  %v114_v24 = vld [vmem:[#allocation5 + $0x1e8] sm:$0xff] }
  0x4b   :  { %1269 = vmatprep.subr.bf16.mxu1 %v1268_v62  ;;  %v118_v25 = vld [vmem:[#allocation5 + $0x208] sm:$0xff]  ;;  %v116_v26 = vld [vmem:[#allocation5 + $0x1f8] sm:$0xff]  ;;  %v1150_v28 = vpack.c.bf16 %v109_v20, %v105_v19  ;;  %v1278_v29 = vpack.c.bf16 %v111_v23, %v107_v21  ;;  %v113_v31 = vld [vmem:[#allocation5 + $0x1e0] sm:$0xff] }
  0x4c   :  { %1143 = vmatpush1.bf16.msra.mxu0 %v1142_v4  ;;  %v120_v27 = vld [vmem:[#allocation5 + $0x218] sm:$0xff]  ;;  %v1152_v30 = vpack.c.bf16 %v118_v25, %v114_v24  ;;  %v117_v32 = vld [vmem:[#allocation5 + $0x200] sm:$0xff]  ;;  %v115_v33 = vld [vmem:[#allocation5 + $0x1f0] sm:$0xff] }
  0x4d   :  { %1145 = vmatprep.subr.bf16.mxu0 %v1144_v6  ;;  %v1280_v34 = vpack.c.bf16 %v120_v27, %v116_v26  ;;  %v119_v35 = vld [vmem:[#allocation5 + $0x210] sm:$0xff]  ;;  %v122_v36 = vld [vmem:[#allocation5 + $0x228] sm:$0xff]  ;;  %v124_v38 = vld [vmem:[#allocation5 + $0x238] sm:$0xff]  ;;  %v1154_v40 = vpack.c.bf16 %v117_v32, %v113_v31 }
  0x4e   :  { %1271 = vmatpush1.bf16.msra.mxu1 %v1270_v5  ;;  %v126_v37 = vld [vmem:[#allocation5 + $0x248] sm:$0xff]  ;;  %v128_v39 = vld [vmem:[#allocation5 + $0x258] sm:$0xff]  ;;  %v1282_v41 = vpack.c.bf16 %v119_v35, %v115_v33  ;;  %v121_v43 = vld [vmem:[#allocation5 + $0x220] sm:$0xff] }
  0x4f   :  { %1273 = vmatprep.subr.bf16.mxu1 %v1272_v10  ;;  %v1156_v42 = vpack.c.bf16 %v126_v37, %v122_v36  ;;  %v125_v44 = vld [vmem:[#allocation5 + $0x240] sm:$0xff]  ;;  %v123_v45 = vld [vmem:[#allocation5 + $0x230] sm:$0xff]  ;;  %v1284_v46 = vpack.c.bf16 %v128_v39, %v124_v38  ;;  %v130_v48 = vld [vmem:[#allocation5 + $0x268] sm:$0xff] }
  0x50   :  { %1147 = vmatpush1.bf16.msra.mxu0 %v1146_v16  ;;  %v127_v47 = vld [vmem:[#allocation5 + $0x250] sm:$0xff]  ;;  %v134_v49 = vld [vmem:[#allocation5 + $0x288] sm:$0xff]  ;;  %v132_v50 = vld [vmem:[#allocation5 + $0x278] sm:$0xff]  ;;  %v1158_v52 = vpack.c.bf16 %v125_v44, %v121_v43 }
  0x51   :  { %1149 = vmatprep.subr.bf16.mxu0 %v1148_v18  ;;  %v136_v51 = vld [vmem:[#allocation5 + $0x298] sm:$0xff]  ;;  %v1286_v53 = vpack.c.bf16 %v127_v47, %v123_v45  ;;  %v1160_v54 = vpack.c.bf16 %v134_v49, %v130_v48  ;;  %v129_v55 = vld [vmem:[#allocation5 + $0x260] sm:$0xff]  ;;  %v131_v57 = vld [vmem:[#allocation5 + $0x270] sm:$0xff] }
  0x52   :  { %1275 = vmatpush1.bf16.msra.mxu1 %v1274_v17  ;;  %v133_v56 = vld [vmem:[#allocation5 + $0x280] sm:$0xff]  ;;  %v1288_v58 = vpack.c.bf16 %v136_v51, %v132_v50  ;;  %v135_v59 = vld [vmem:[#allocation5 + $0x290] sm:$0xff]  ;;  %v138_v60 = vld [vmem:[#allocation5 + $0x2a8] sm:$0xff] }
  0x53   :  { %1277 = vmatprep.subr.bf16.mxu1 %v1276_v22  ;;  %v142_v61 = vld [vmem:[#allocation5 + $0x2c8] sm:$0xff]  ;;  %v140_v62 = vld [vmem:[#allocation5 + $0x2b8] sm:$0xff]  ;;  %v1162_v0 = vpack.c.bf16 %v133_v56, %v129_v55  ;;  %v1290_v1 = vpack.c.bf16 %v135_v59, %v131_v57  ;;  %v137_v3 = vld [vmem:[#allocation5 + $0x2a0] sm:$0xff] }
  0x54   :  { %1151 = vmatpush1.bf16.msra.mxu0 %v1150_v28  ;;  %v144_v63 = vld [vmem:[#allocation5 + $0x2d8] sm:$0xff]  ;;  %v1164_v2 = vpack.c.bf16 %v142_v61, %v138_v60  ;;  %v141_v4 = vld [vmem:[#allocation5 + $0x2c0] sm:$0xff]  ;;  %v139_v5 = vld [vmem:[#allocation5 + $0x2b0] sm:$0xff] }
  0x55   :  { %1153 = vmatprep.subr.bf16.mxu0 %v1152_v30  ;;  %v1292_v6 = vpack.c.bf16 %v144_v63, %v140_v62  ;;  %v143_v7 = vld [vmem:[#allocation5 + $0x2d0] sm:$0xff]  ;;  %v146_v8 = vld [vmem:[#allocation5 + $0x2e8] sm:$0xff]  ;;  %v148_v10 = vld [vmem:[#allocation5 + $0x2f8] sm:$0xff]  ;;  %v1166_v12 = vpack.c.bf16 %v141_v4, %v137_v3 }
  0x56   :  { %1279 = vmatpush1.bf16.msra.mxu1 %v1278_v29  ;;  %v150_v9 = vld [vmem:[#allocation5 + $0x308] sm:$0xff]  ;;  %v152_v11 = vld [vmem:[#allocation5 + $0x318] sm:$0xff]  ;;  %v1294_v13 = vpack.c.bf16 %v143_v7, %v139_v5  ;;  %v145_v15 = vld [vmem:[#allocation5 + $0x2e0] sm:$0xff] }
  0x57   :  { %1281 = vmatprep.subr.bf16.mxu1 %v1280_v34  ;;  %v1168_v14 = vpack.c.bf16 %v150_v9, %v146_v8  ;;  %v149_v16 = vld [vmem:[#allocation5 + $0x300] sm:$0xff]  ;;  %v147_v17 = vld [vmem:[#allocation5 + $0x2f0] sm:$0xff]  ;;  %v1296_v18 = vpack.c.bf16 %v152_v11, %v148_v10  ;;  %v154_v20 = vld [vmem:[#allocation5 + $0x328] sm:$0xff] }
  0x58   :  { %1155 = vmatpush1.bf16.msra.mxu0 %v1154_v40  ;;  %v151_v19 = vld [vmem:[#allocation5 + $0x310] sm:$0xff]  ;;  %v158_v21 = vld [vmem:[#allocation5 + $0x348] sm:$0xff]  ;;  %v156_v22 = vld [vmem:[#allocation5 + $0x338] sm:$0xff]  ;;  %v1170_v24 = vpack.c.bf16 %v149_v16, %v145_v15 }
  0x59   :  { %1157 = vmatprep.subr.bf16.mxu0 %v1156_v42  ;;  %v160_v23 = vld [vmem:[#allocation5 + $0x358] sm:$0xff]  ;;  %v1298_v25 = vpack.c.bf16 %v151_v19, %v147_v17  ;;  %v1172_v26 = vpack.c.bf16 %v158_v21, %v154_v20  ;;  %v153_v27 = vld [vmem:[#allocation5 + $0x320] sm:$0xff]  ;;  %v155_v29 = vld [vmem:[#allocation5 + $0x330] sm:$0xff] }
  0x5a   :  { %1283 = vmatpush1.bf16.msra.mxu1 %v1282_v41  ;;  %v157_v28 = vld [vmem:[#allocation5 + $0x340] sm:$0xff]  ;;  %v1300_v30 = vpack.c.bf16 %v160_v23, %v156_v22  ;;  %v159_v31 = vld [vmem:[#allocation5 + $0x350] sm:$0xff]  ;;  %v162_v32 = vld [vmem:[#allocation5 + $0x368] sm:$0xff] }
  0x5b   :  { %1285 = vmatprep.subr.bf16.mxu1 %v1284_v46  ;;  %v166_v33 = vld [vmem:[#allocation5 + $0x388] sm:$0xff]  ;;  %v164_v34 = vld [vmem:[#allocation5 + $0x378] sm:$0xff]  ;;  %v1174_v36 = vpack.c.bf16 %v157_v28, %v153_v27  ;;  %v1302_v37 = vpack.c.bf16 %v159_v31, %v155_v29  ;;  %v161_v39 = vld [vmem:[#allocation5 + $0x360] sm:$0xff] }
  0x5c   :  { %1159 = vmatpush1.bf16.msra.mxu0 %v1158_v52  ;;  %v168_v35 = vld [vmem:[#allocation5 + $0x398] sm:$0xff]  ;;  %v1176_v38 = vpack.c.bf16 %v166_v33, %v162_v32  ;;  %v165_v40 = vld [vmem:[#allocation5 + $0x380] sm:$0xff]  ;;  %v163_v41 = vld [vmem:[#allocation5 + $0x370] sm:$0xff] }
  0x5d   :  { %1161 = vmatprep.subr.bf16.mxu0 %v1160_v54  ;;  %v1304_v42 = vpack.c.bf16 %v168_v35, %v164_v34  ;;  %v167_v43 = vld [vmem:[#allocation5 + $0x390] sm:$0xff]  ;;  %v170_v44 = vld [vmem:[#allocation5 + $0x3a8] sm:$0xff]  ;;  %v172_v46 = vld [vmem:[#allocation5 + $0x3b8] sm:$0xff]  ;;  %v1178_v48 = vpack.c.bf16 %v165_v40, %v161_v39 }
  0x5e   :  { %1287 = vmatpush1.bf16.msra.mxu1 %v1286_v53  ;;  %v174_v45 = vld [vmem:[#allocation5 + $0x3c8] sm:$0xff]  ;;  %v176_v47 = vld [vmem:[#allocation5 + $0x3d8] sm:$0xff]  ;;  %v1306_v49 = vpack.c.bf16 %v167_v43, %v163_v41  ;;  %v169_v51 = vld [vmem:[#allocation5 + $0x3a0] sm:$0xff] }
  0x5f   :  { %1289 = vmatprep.subr.bf16.mxu1 %v1288_v58  ;;  %v1180_v50 = vpack.c.bf16 %v174_v45, %v170_v44  ;;  %v173_v52 = vld [vmem:[#allocation5 + $0x3c0] sm:$0xff]  ;;  %v1308_v53 = vpack.c.bf16 %v176_v47, %v172_v46  ;;  %v171_v54 = vld [vmem:[#allocation5 + $0x3b0] sm:$0xff]  ;;  %v178_v58 = vld [vmem:[#allocation5 + $0x3e8] sm:$0xff] }
  0x60   :  { %1163 = vmatpush1.bf16.msra.mxu0 %v1162_v0  ;;  %v175_v55 = vld [vmem:[#allocation5 + $0x3d0] sm:$0xff]  ;;  %v1182_v56 = vpack.c.bf16 %v173_v52, %v169_v51  ;;  %v182_v59 = vld [vmem:[#allocation5 + $0x408] sm:$0xff]  ;;  %v180_v60 = vld [vmem:[#allocation5 + $0x3f8] sm:$0xff] }
  0x61   :  { %1165 = vmatprep.subr.bf16.mxu0 %v1164_v2  ;;  %v1310_v57 = vpack.c.bf16 %v175_v55, %v171_v54  ;;  %v1184_v61 = vpack.c.bf16 %v182_v59, %v178_v58  ;;  %v184_v62 = vld [vmem:[#allocation5 + $0x418] sm:$0xff]  ;;  %v177_v63 = vld [vmem:[#allocation5 + $0x3e0] sm:$0xff]  ;;  %v179_v3 = vld [vmem:[#allocation5 + $0x3f0] sm:$0xff] }
  0x62   :  { %1291 = vmatpush1.bf16.msra.mxu1 %v1290_v1  ;;  %v181_v0 = vld [vmem:[#allocation5 + $0x400] sm:$0xff]  ;;  %v1312_v1 = vpack.c.bf16 %v184_v62, %v180_v60  ;;  %v183_v4 = vld [vmem:[#allocation5 + $0x410] sm:$0xff]  ;;  %v190_v7 = vld [vmem:[#allocation5 + $0x448] sm:$0xff] }
  0x63   :  { %1293 = vmatprep.subr.bf16.mxu1 %v1292_v6  ;;  %v1186_v2 = vpack.c.bf16 %v181_v0, %v177_v63  ;;  %v1314_v5 = vpack.c.bf16 %v183_v4, %v179_v3  ;;  %v186_v6 = vld [vmem:[#allocation5 + $0x428] sm:$0xff]  ;;  %v188_v8 = vld [vmem:[#allocation5 + $0x438] sm:$0xff]  ;;  %v1623_v15 = vld [vmem:[#allocation7] sm:$0x77] }
  0x64   :  { %1167 = vmatpush1.bf16.msra.mxu0 %v1166_v12  ;;  %v1188_v9 = vpack.c.bf16 %v190_v7, %v186_v6  ;;  %v192_v10 = vld [vmem:[#allocation5 + $0x458] sm:$0xff]  ;;  %v381_v12 = vlaneseq  ;;  %v1626_v17 = vld [vmem:[#allocation7 + $0x8] sm:$0x77]  ;;  %v187_v29 = vld [vmem:[#allocation5 + $0x430] sm:$0xff] }
  0x65   :  { %1169 = vmatprep.subr.bf16.mxu0 %v1168_v14  ;;  %v1316_v11 = vpack.c.bf16 %v192_v10, %v188_v8  ;;  %v194_v31 = vld [vmem:[#allocation5 + $0x468] sm:$0xff]  ;;  %v196_v35 = vld [vmem:[#allocation5 + $0x478] sm:$0xff]  ;;  %v197_v43 = vld [vmem:[#allocation5 + $0x480] sm:$0xff] }
  0x66   :  { %1295 = vmatpush1.bf16.msra.mxu1 %v1294_v13  ;;  %v1618_v13 = vshrl.u32 %v381_v12, 7  ;;  %v198_v34 = vld [vmem:[#allocation5 + $0x488] sm:$0xff]  ;;  %v195_v47 = vld [vmem:[#allocation5 + $0x470] sm:$0xff]  ;;  %v204_v51 = vld [vmem:[#allocation5 + $0x4b8] sm:$0xff] }
  0x67   :  { %1297 = vmatprep.subr.bf16.mxu1 %v1296_v18  ;;  %v1192_v45 = vpack.c.bf16 %v198_v34, %v194_v31  ;;  %v208_v52 = vld [vmem:[#allocation5 + $0x4d8] sm:$0xff]  ;;  %v203_v60 = vld [vmem:[#allocation5 + $0x4b0] sm:$0xff]  ;;  %v210_v62 = vld [vmem:[#allocation5 + $0x4e8] sm:$0xff] }
  0x68   :  { %1171 = vmatpush1.bf16.msra.mxu0 %v1170_v24  ;;  %v1621_v14 = vsub.s32 0, %v1618_v13  ;;  %v387_v16 = vsub.s32 4, %v1618_v13  ;;  %v1324_v59 = vpack.c.bf16 %v208_v52, %v204_v51  ;;  %v214_v63 = vld [vmem:[#allocation5 + $0x508] sm:$0xff]  ;;  %v212_v0 = vld [vmem:[#allocation5 + $0x4f8] sm:$0xff]  ;;  %v209_v4 = vld [vmem:[#allocation5 + $0x4e0] sm:$0xff] }
  0x69   :  { %1173 = vmatprep.subr.bf16.mxu0 %v1172_v26  ;;  %v189_v26 = vld [vmem:[#allocation5 + $0x440] sm:$0xff]  ;;  %v1200_v6 = vpack.c.bf16 %v214_v63, %v210_v62  ;;  %v211_v8 = vld [vmem:[#allocation5 + $0x4f0] sm:$0xff]  ;;  %v218_v10 = vld [vmem:[#allocation5 + $0x528] sm:$0xff] }
  0x6a   :  { %1299 = vmatpush1.bf16.msra.mxu1 %v1298_v25  ;;  %v384_v18 = vrot.slane %v1623_v15, %v1621_v14  ;;  %v388_v19 = vrot.slane %v1623_v15, %v387_v16  ;;  %v396_v20 = vrot.slane %v1626_v17, %v387_v16  ;;  %v185_v25 = vld [vmem:[#allocation5 + $0x420] sm:$0xff]  ;;  %v220_v12 = vld [vmem:[#allocation5 + $0x538] sm:$0xff]  ;;  %v242_v51 = vld [vmem:[#allocation5 + $0x5e8] sm:$0xff] }
  0x6b   :  { %1301 = vmatprep.subr.bf16.mxu1 %v1300_v30  ;;  %v191_v30 = vld [vmem:[#allocation5 + $0x450] sm:$0xff]  ;;  %v1190_v40 = vpack.c.bf16 %v189_v26, %v185_v25  ;;  %v224_v16 = vld [vmem:[#allocation5 + $0x558] sm:$0xff]  ;;  %v226_v26 = vld [vmem:[#allocation5 + $0x568] sm:$0xff] }
  0x6c   :  { %1175 = vmatpush1.bf16.msra.mxu0 %v1174_v36  ;;  %v404_v21 = vrot.slane %v384_v18, %v1621_v14  ;;  %v408_v22 = vrot.slane %v388_v19, %v1621_v14  ;;  %v416_v23 = vrot.slane %v396_v20, %v1621_v14  ;;  %v200_v36 = vld [vmem:[#allocation5 + $0x498] sm:$0xff]  ;;  %v1318_v41 = vpack.c.bf16 %v191_v30, %v187_v29  ;;  %v217_v20 = vld [vmem:[#allocation5 + $0x520] sm:$0xff]  ;;  %v223_v25 = vld [vmem:[#allocation5 + $0x550] sm:$0xff] }
  0x6d   :  { %1177 = vmatprep.subr.bf16.mxu0 %v1176_v38  ;;  %v1320_v46 = vpack.c.bf16 %v200_v36, %v196_v35  ;;  %v232_v29 = vld [vmem:[#allocation5 + $0x598] sm:$0xff]  ;;  %v229_v34 = vld [vmem:[#allocation5 + $0x580] sm:$0xff]  ;;  %v246_v52 = vld [vmem:[#allocation5 + $0x608] sm:$0xff] }
  0x6e   :  { %1303 = vmatpush1.bf16.msra.mxu1 %v1302_v37  ;;  %v247_v62 = vld [vmem:[#allocation5 + $0x610] sm:$0xff]  ;;  %v250_v63 = vld [vmem:[#allocation5 + $0x628] sm:$0xff] }
  0x6f   :  { %1305 = vmatprep.subr.bf16.mxu1 %v1304_v42  ;;  %v193_v42 = vld [vmem:[#allocation5 + $0x460] sm:$0xff] }
  0x70   :  { %1179 = vmatpush1.bf16.msra.mxu0 %v1178_v48  ;;  %v199_v48 = vld [vmem:[#allocation5 + $0x490] sm:$0xff]  ;;  %v1194_v54 = vpack.c.bf16 %v197_v43, %v193_v42  ;;  %v240_v42 = vld [vmem:[#allocation5 + $0x5d8] sm:$0xff] }
  0x71   :  { %1181 = vmatprep.subr.bf16.mxu0 %v1180_v50  ;;  %v206_v50 = vld [vmem:[#allocation5 + $0x4c8] sm:$0xff]  ;;  %v1322_v55 = vpack.c.bf16 %v199_v48, %v195_v47 }
  0x72   :  { %1307 = vmatpush1.bf16.msra.mxu1 %v1306_v49  ;;  %v202_v49 = vld [vmem:[#allocation5 + $0x4a8] sm:$0xff] }
  0x73   :  { %1309 = vmatprep.subr.bf16.mxu1 %v1308_v53  ;;  %v1196_v58 = vpack.c.bf16 %v206_v50, %v202_v49  ;;  %v235_v49 = vld [vmem:[#allocation5 + $0x5b0] sm:$0xff] }
  0x74   :  { %1183 = vmatpush1.bf16.msra.mxu0 %v1182_v56  ;;  %v201_v56 = vld [vmem:[#allocation5 + $0x4a0] sm:$0xff]  ;;  %v239_v50 = vld [vmem:[#allocation5 + $0x5d0] sm:$0xff] }
  0x75   :  { %1185 = vmatprep.subr.bf16.mxu0 %v1184_v61  ;;  %v207_v61 = vld [vmem:[#allocation5 + $0x4d0] sm:$0xff] }
  0x76   :  { %1311 = vmatpush1.bf16.msra.mxu1 %v1310_v57  ;;  %v205_v57 = vld [vmem:[#allocation5 + $0x4c0] sm:$0xff]  ;;  %v1326_v3 = vpack.c.bf16 %v207_v61, %v203_v60  ;;  %v243_v61 = vld [vmem:[#allocation5 + $0x5f0] sm:$0xff] }
  0x77   :  { %1313 = vmatprep.subr.bf16.mxu1 %v1312_v1  ;;  %v216_v1 = vld [vmem:[#allocation5 + $0x518] sm:$0xff] }
  0x78   :  { %1187 = vmatpush1.bf16.msra.mxu0 %v1186_v2  ;;  %v1198_v2 = vpack.c.bf16 %v205_v57, %v201_v56  ;;  %v1328_v7 = vpack.c.bf16 %v216_v1, %v212_v0  ;;  %v1342_v56 = vpack.c.bf16 %v239_v50, %v235_v49  ;;  %v241_v57 = vld [vmem:[#allocation5 + $0x5e0] sm:$0xff]  ;;  %v254_v0 = vld [vmem:[#allocation5 + $0x648] sm:$0xff]  ;;  %v252_v1 = vld [vmem:[#allocation5 + $0x638] sm:$0xff] }
  0x79   :  { %1189 = vmatprep.subr.bf16.mxu0 %v1188_v9  ;;  %v215_v9 = vld [vmem:[#allocation5 + $0x510] sm:$0xff] }
  0x7a   :  { %1315 = vmatpush1.bf16.msra.mxu1 %v1314_v5  ;;  %v213_v5 = vld [vmem:[#allocation5 + $0x500] sm:$0xff]  ;;  %v1330_v19 = vpack.c.bf16 %v215_v9, %v211_v8  ;;  %v251_v9 = vld [vmem:[#allocation5 + $0x630] sm:$0xff] }
  0x7b   :  { %1317 = vmatprep.subr.bf16.mxu1 %v1316_v11  ;;  %v222_v11 = vld [vmem:[#allocation5 + $0x548] sm:$0xff]  ;;  %v1202_v18 = vpack.c.bf16 %v213_v5, %v209_v4  ;;  %v1346_v4 = vpack.c.bf16 %v247_v62, %v243_v61  ;;  %v249_v5 = vld [vmem:[#allocation5 + $0x620] sm:$0xff]  ;;  %v275_v50 = vld [vmem:[#allocation5 + $0x6f0] sm:$0xff] }
  0x7c   :  { %v283_v62 = vld [vmem:[#allocation5 + $0x730] sm:$0xff] }
 0x10d   :  { %v487_v24 = vpop.f32.mrb[0].mxu0 }
 0x10e   :  { %v488_v27 = vadd.f32 %v487_v24, %v404_v21  ;;  %v489_v28 = vpop.f32.mrb[1].mxu0  ;;  %v1635_v32 = vpop.f32.mrb[0].mxu1  ;;  %v221_v21 = vld [vmem:[#allocation5 + $0x540] sm:$0xff]  ;;  %v219_v24 = vld [vmem:[#allocation5 + $0x530] sm:$0xff] }
 0x10f   :  { %v490_v33 = vadd.f32 %v489_v28, %v408_v22  ;;  %v560_v37 = vpop.f32.mrb[1].mxu1  ;;  %v1204_v22 = vpack.c.bf16 %v222_v11, %v218_v10  ;;  %v228_v28 = vld [vmem:[#allocation5 + $0x578] sm:$0xff]  ;;  %v1206_v30 = vpack.c.bf16 %v221_v21, %v217_v20  ;;  %v1334_v31 = vpack.c.bf16 %v223_v25, %v219_v24  ;;  %v255_v10 = vld [vmem:[#allocation5 + $0x650] sm:$0xff]  ;;  %v258_v11 = vld [vmem:[#allocation5 + $0x668] sm:$0xff] }
 0x110   :  { %v561_v38 = vadd.f32 %v560_v37, %v416_v23  ;;  %v563_v44 = vmax.f32 %v488_v27, 0.0  ;;  %v1332_v23 = vpack.c.bf16 %v224_v16, %v220_v12  ;;  %v230_v27 = vld [vmem:[#allocation5 + $0x588] sm:$0xff]  ;;  %v1336_v36 = vpack.c.bf16 %v232_v29, %v228_v28  ;;  %v227_v37 = vld [vmem:[#allocation5 + $0x570] sm:$0xff]  ;;  %v260_v16 = vld [vmem:[#allocation5 + $0x678] sm:$0xff] }
 0x111   :  { %v564_v39 = vmax.f32 %v490_v33, 0.0  ;;  %v225_v33 = vld [vmem:[#allocation5 + $0x560] sm:$0xff]  ;;  %v1208_v35 = vpack.c.bf16 %v230_v27, %v226_v26  ;;  %v262_v12 = vld [vmem:[#allocation5 + $0x688] sm:$0xff]  ;;  %v1350_v20 = vpack.c.bf16 %v255_v10, %v251_v9  ;;  %v259_v25 = vld [vmem:[#allocation5 + $0x670] sm:$0xff] }
 0x112   :  { %v566_v53 = vmax.f32 %v561_v38, 0.0  ;;  %v231_v38 = vld [vmem:[#allocation5 + $0x590] sm:$0xff]  ;;  %v1210_v43 = vpack.c.bf16 %v229_v34, %v225_v33  ;;  %v257_v21 = vld [vmem:[#allocation5 + $0x660] sm:$0xff]  ;;  %v266_v27 = vld [vmem:[#allocation5 + $0x6a8] sm:$0xff] }
 0x113   :  { %667 = vmatprep.mubr.f32.mxu0 %v564_v39  ;;  %809 = vmatprep.mubr.f32.mxu1 %v564_v39  ;;  %v234_v39 = vld [vmem:[#allocation5 + $0x5a8] sm:$0xff]  ;;  %v263_v26 = vld [vmem:[#allocation5 + $0x690] sm:$0xff]  ;;  %v268_v29 = vld [vmem:[#allocation5 + $0x6b8] sm:$0xff] }
 0x114   :  { %668 = vmatmul.mubr.f32.vlgmr.msra.gmra.mrb[2].mxu0 %v563_v44  ;;  %810 = vmatmul.mubr.f32.vlgmr.msra.gmra.mrb[2].mxu1 %v563_v44  ;;  %v1338_v44 = vpack.c.bf16 %v231_v38, %v227_v37  ;;  %v270_v28 = vld [vmem:[#allocation5 + $0x6c8] sm:$0xff]  ;;  %v1354_v33 = vpack.c.bf16 %v263_v26, %v259_v25  ;;  %v265_v34 = vld [vmem:[#allocation5 + $0x6a0] sm:$0xff]  ;;  %v267_v38 = vld [vmem:[#allocation5 + $0x6b0] sm:$0xff] }
 0x115   :  { %1191 = vmatpush1.bf16.msra.mxu0 %v1190_v40  ;;  %1319 = vmatpush1.bf16.msra.mxu1 %v1318_v41  ;;  %v238_v40 = vld [vmem:[#allocation5 + $0x5c8] sm:$0xff]  ;;  %v236_v41 = vld [vmem:[#allocation5 + $0x5b8] sm:$0xff]  ;;  %v291_v10 = vld [vmem:[#allocation5 + $0x770] sm:$0xff] }
 0x116   :  { %1193 = vmatprep.subr.bf16.mxu0 %v1192_v45  ;;  %1321 = vmatprep.subr.bf16.mxu1 %v1320_v46  ;;  %v233_v45 = vld [vmem:[#allocation5 + $0x5a0] sm:$0xff]  ;;  %v1212_v47 = vpack.c.bf16 %v238_v40, %v234_v39  ;;  %v1340_v48 = vpack.c.bf16 %v240_v42, %v236_v41  ;;  %v271_v39 = vld [vmem:[#allocation5 + $0x6d0] sm:$0xff]  ;;  %v274_v40 = vld [vmem:[#allocation5 + $0x6e8] sm:$0xff] }
 0x117   :  { %738 = vmatprep.mubr.f32.mxu0 %v566_v53  ;;  %880 = vmatprep.mubr.f32.mxu1 %v566_v53  ;;  %v237_v46 = vld [vmem:[#allocation5 + $0x5c0] sm:$0xff]  ;;  %v244_v53 = vld [vmem:[#allocation5 + $0x5f8] sm:$0xff]  ;;  %v278_v41 = vld [vmem:[#allocation5 + $0x708] sm:$0xff] }
 0x118   :  { %v276_v42 = vld [vmem:[#allocation5 + $0x6f8] sm:$0xff] }
 0x119   :  { %1195 = vmatpush1.bf16.msra.mxu0 %v1194_v54  ;;  %1323 = vmatpush1.bf16.msra.mxu1 %v1322_v55  ;;  %v248_v54 = vld [vmem:[#allocation5 + $0x618] sm:$0xff]  ;;  %v1214_v55 = vpack.c.bf16 %v237_v46, %v233_v45  ;;  %v1358_v45 = vpack.c.bf16 %v271_v39, %v267_v38  ;;  %v273_v46 = vld [vmem:[#allocation5 + $0x6e0] sm:$0xff] }
 0x11a   :  { %1197 = vmatprep.subr.bf16.mxu0 %v1196_v58  ;;  %1325 = vmatprep.subr.bf16.mxu1 %v1324_v59  ;;  %v245_v58 = vld [vmem:[#allocation5 + $0x600] sm:$0xff]  ;;  %v1216_v59 = vpack.c.bf16 %v246_v52, %v242_v51  ;;  %v1344_v60 = vpack.c.bf16 %v248_v54, %v244_v53  ;;  %v279_v51 = vld [vmem:[#allocation5 + $0x710] sm:$0xff]  ;;  %v282_v52 = vld [vmem:[#allocation5 + $0x728] sm:$0xff] }
 0x11b   :  { %v286_v53 = vld [vmem:[#allocation5 + $0x748] sm:$0xff]  ;;  %v284_v54 = vld [vmem:[#allocation5 + $0x738] sm:$0xff] }
 0x11d   :  { %1199 = vmatpush1.bf16.msra.mxu0 %v1198_v2  ;;  %1327 = vmatpush1.bf16.msra.mxu1 %v1326_v3  ;;  %v256_v2 = vld [vmem:[#allocation5 + $0x658] sm:$0xff]  ;;  %v1218_v3 = vpack.c.bf16 %v245_v58, %v241_v57  ;;  %v1362_v57 = vpack.c.bf16 %v279_v51, %v275_v50  ;;  %v281_v58 = vld [vmem:[#allocation5 + $0x720] sm:$0xff] }
 0x11e   :  { %1201 = vmatprep.subr.bf16.mxu0 %v1200_v6  ;;  %1329 = vmatprep.subr.bf16.mxu1 %v1328_v7  ;;  %v253_v6 = vld [vmem:[#allocation5 + $0x640] sm:$0xff]  ;;  %v1220_v7 = vpack.c.bf16 %v254_v0, %v250_v63  ;;  %v1348_v8 = vpack.c.bf16 %v256_v2, %v252_v1  ;;  %v287_v63 = vld [vmem:[#allocation5 + $0x750] sm:$0xff]  ;;  %v290_v0 = vld [vmem:[#allocation5 + $0x768] sm:$0xff] }
 0x11f   :  { %v294_v1 = vld [vmem:[#allocation5 + $0x788] sm:$0xff]  ;;  %v292_v2 = vld [vmem:[#allocation5 + $0x778] sm:$0xff]  ;;  %v314_v50 = vld [vmem:[#allocation5 + $0x840] sm:$0xff] }
 0x121   :  { %1203 = vmatpush1.bf16.msra.mxu0 %v1202_v18  ;;  %1331 = vmatpush1.bf16.msra.mxu1 %v1330_v19  ;;  %v264_v18 = vld [vmem:[#allocation5 + $0x698] sm:$0xff]  ;;  %v1222_v19 = vpack.c.bf16 %v253_v6, %v249_v5  ;;  %v1366_v5 = vpack.c.bf16 %v287_v63, %v283_v62  ;;  %v289_v6 = vld [vmem:[#allocation5 + $0x760] sm:$0xff] }
 0x122   :  { %1205 = vmatprep.subr.bf16.mxu0 %v1204_v22  ;;  %1333 = vmatprep.subr.bf16.mxu1 %v1332_v23  ;;  %v261_v22 = vld [vmem:[#allocation5 + $0x680] sm:$0xff]  ;;  %v1224_v23 = vpack.c.bf16 %v262_v12, %v258_v11  ;;  %v1352_v24 = vpack.c.bf16 %v264_v18, %v260_v16  ;;  %v295_v11 = vld [vmem:[#allocation5 + $0x790] sm:$0xff]  ;;  %v298_v12 = vld [vmem:[#allocation5 + $0x7a8] sm:$0xff] }
 0x123   :  { %v302_v16 = vld [vmem:[#allocation5 + $0x7c8] sm:$0xff]  ;;  %v300_v18 = vld [vmem:[#allocation5 + $0x7b8] sm:$0xff]  ;;  %v316_v62 = vld [vmem:[#allocation5 + $0x880] sm:$0xff] }
 0x124   :  { %v1244_v25 = vpack.c.bf16 %v302_v16, %v298_v12  ;;  %v349_v16 = vld [vmem:[#allocation5 + $0xca0] sm:$0xff] }
 0x125   :  { %1207 = vmatpush1.bf16.msra.mxu0 %v1206_v30  ;;  %1335 = vmatpush1.bf16.msra.mxu1 %v1334_v31  ;;  %v272_v30 = vld [vmem:[#allocation5 + $0x6d8] sm:$0xff]  ;;  %v1226_v31 = vpack.c.bf16 %v261_v22, %v257_v21  ;;  %v1370_v21 = vpack.c.bf16 %v295_v11, %v291_v10  ;;  %v297_v22 = vld [vmem:[#allocation5 + $0x7a0] sm:$0xff] }
 0x126   :  { %1209 = vmatprep.subr.bf16.mxu0 %v1208_v35  ;;  %1337 = vmatprep.subr.bf16.mxu1 %v1336_v36  ;;  %v269_v35 = vld [vmem:[#allocation5 + $0x6c0] sm:$0xff]  ;;  %v1228_v36 = vpack.c.bf16 %v270_v28, %v266_v27  ;;  %v1356_v37 = vpack.c.bf16 %v272_v30, %v268_v29  ;;  %v299_v27 = vld [vmem:[#allocation5 + $0x7b0] sm:$0xff]  ;;  %v306_v29 = vld [vmem:[#allocation5 + $0x7e8] sm:$0xff] }
 0x127   :  { %v303_v28 = vld [vmem:[#allocation5 + $0x7d0] sm:$0xff]  ;;  %v310_v30 = vld [vmem:[#allocation5 + $0x808] sm:$0xff]  ;;  %v318_v10 = vld [vmem:[#allocation5 + $0x8c0] sm:$0xff] }
 0x128   :  { %v1248_v39 = vpack.c.bf16 %v310_v30, %v306_v29  ;;  %v351_v29 = vld [vmem:[#allocation5 + $0xce0] sm:$0xff] }
 0x129   :  { %1211 = vmatpush1.bf16.msra.mxu0 %v1210_v43  ;;  %1339 = vmatpush1.bf16.msra.mxu1 %v1338_v44  ;;  %v280_v43 = vld [vmem:[#allocation5 + $0x718] sm:$0xff]  ;;  %v1230_v44 = vpack.c.bf16 %v269_v35, %v265_v34  ;;  %v1374_v35 = vpack.c.bf16 %v303_v28, %v299_v27  ;;  %v352_v30 = vld [vmem:[#allocation5 + $0xd00] sm:$0xff] }
 0x12a   :  { %1213 = vmatprep.subr.bf16.mxu0 %v1212_v47  ;;  %1341 = vmatprep.subr.bf16.mxu1 %v1340_v48  ;;  %v277_v47 = vld [vmem:[#allocation5 + $0x700] sm:$0xff]  ;;  %v1232_v48 = vpack.c.bf16 %v278_v41, %v274_v40  ;;  %v1360_v49 = vpack.c.bf16 %v280_v43, %v276_v42  ;;  %v307_v41 = vld [vmem:[#allocation5 + $0x7f0] sm:$0xff] }
 0x12b   :  { %v311_v42 = vld [vmem:[#allocation5 + $0x810] sm:$0xff]  ;;  %v329_v43 = vld [vmem:[#allocation5 + $0xa20] sm:$0xff] }
 0x12d   :  { %1215 = vmatpush1.bf16.msra.mxu0 %v1214_v55  ;;  %1343 = vmatpush1.bf16.msra.mxu1 %v1342_v56  ;;  %v288_v55 = vld [vmem:[#allocation5 + $0x758] sm:$0xff]  ;;  %v1234_v56 = vpack.c.bf16 %v277_v47, %v273_v46  ;;  %v362_v46 = vld [vmem:[#allocation5 + $0xe40] sm:$0xff] }
 0x12e   :  { %1217 = vmatprep.subr.bf16.mxu0 %v1216_v59  ;;  %1345 = vmatprep.subr.bf16.mxu1 %v1344_v60  ;;  %v285_v59 = vld [vmem:[#allocation5 + $0x740] sm:$0xff]  ;;  %v1236_v60 = vpack.c.bf16 %v286_v53, %v282_v52  ;;  %v1364_v61 = vpack.c.bf16 %v288_v55, %v284_v54 }
 0x12f   :  { %v345_v53 = vld [vmem:[#allocation5 + $0xc20] sm:$0xff] }
 0x130   :  { %v346_v54 = vld [vmem:[#allocation5 + $0xc40] sm:$0xff] }
 0x131   :  { %1219 = vmatpush1.bf16.msra.mxu0 %v1218_v3  ;;  %1347 = vmatpush1.bf16.msra.mxu1 %v1346_v4  ;;  %v296_v3 = vld [vmem:[#allocation5 + $0x798] sm:$0xff]  ;;  %v1238_v4 = vpack.c.bf16 %v285_v59, %v281_v58  ;;  %v331_v55 = vld [vmem:[#allocation5 + $0xa60] sm:$0xff] }
 0x132   :  { %1221 = vmatprep.subr.bf16.mxu0 %v1220_v7  ;;  %1349 = vmatprep.subr.bf16.mxu1 %v1348_v8  ;;  %v293_v7 = vld [vmem:[#allocation5 + $0x780] sm:$0xff]  ;;  %v1240_v8 = vpack.c.bf16 %v294_v1, %v290_v0  ;;  %v1368_v9 = vpack.c.bf16 %v296_v3, %v292_v2 }
 0x133   :  { %v364_v58 = vld [vmem:[#allocation5 + $0xe80] sm:$0xff] }
 0x134   :  { %v347_v1 = vld [vmem:[#allocation5 + $0xc60] sm:$0xff] }
 0x135   :  { %1223 = vmatpush1.bf16.msra.mxu0 %v1222_v19  ;;  %1351 = vmatpush1.bf16.msra.mxu1 %v1350_v20  ;;  %v304_v19 = vld [vmem:[#allocation5 + $0x7d8] sm:$0xff]  ;;  %v1242_v20 = vpack.c.bf16 %v293_v7, %v289_v6  ;;  %v348_v2 = vld [vmem:[#allocation5 + $0xc80] sm:$0xff] }
 0x136   :  { %1225 = vmatprep.subr.bf16.mxu0 %v1224_v23  ;;  %1353 = vmatprep.subr.bf16.mxu1 %v1352_v24  ;;  %v301_v23 = vld [vmem:[#allocation5 + $0x7c0] sm:$0xff]  ;;  %v392_v24 = vrot.slane %v1626_v17, %v1621_v14  ;;  %v1372_v26 = vpack.c.bf16 %v304_v19, %v300_v18 }
 0x137   :  { %v1246_v34 = vpack.c.bf16 %v301_v23, %v297_v22  ;;  %v333_v3 = vld [vmem:[#allocation5 + $0xaa0] sm:$0xff] }
 0x138   :  { %v412_v38 = vrot.slane %v392_v24, %v1621_v14  ;;  %v366_v6 = vld [vmem:[#allocation5 + $0xec0] sm:$0xff] }
 0x139   :  { %1227 = vmatpush1.bf16.msra.mxu0 %v1226_v31  ;;  %1355 = vmatpush1.bf16.msra.mxu1 %v1354_v33  ;;  %v308_v31 = vld [vmem:[#allocation5 + $0x7f8] sm:$0xff]  ;;  %v350_v18 = vld [vmem:[#allocation5 + $0xcc0] sm:$0xff] }
 0x13a   :  { %1229 = vmatprep.subr.bf16.mxu0 %v1228_v36  ;;  %1357 = vmatprep.subr.bf16.mxu1 %v1356_v37  ;;  %v312_v33 = vld [vmem:[#allocation5 + $0x818] sm:$0xff]  ;;  %v305_v36 = vld [vmem:[#allocation5 + $0x7e0] sm:$0xff]  ;;  %v559_v51 = vadd.f32 %v1635_v32, %v412_v38  ;;  %v1422_v24 = vpack.c.bf16 %v350_v18, %v349_v16 }
 0x13b   :  { %v309_v37 = vld [vmem:[#allocation5 + $0x800] sm:$0xff]  ;;  %v1376_v40 = vpack.c.bf16 %v312_v33, %v308_v31 }
 0x13c   :  { %v1250_v47 = vpack.c.bf16 %v309_v37, %v305_v36  ;;  %v565_v63 = vmax.f32 %v559_v51, 0.0  ;;  %v335_v19 = vld [vmem:[#allocation5 + $0xae0] sm:$0xff]  ;;  %v1426_v37 = vpack.c.bf16 %v352_v30, %v351_v29 }
 0x13d   :  { %1231 = vmatpush1.bf16.msra.mxu0 %v1230_v44  ;;  %1359 = vmatpush1.bf16.msra.mxu1 %v1358_v45  ;;  %v330_v44 = vld [vmem:[#allocation5 + $0xa40] sm:$0xff] }
 0x13e   :  { %1233 = vmatprep.subr.bf16.mxu0 %v1232_v48  ;;  %1361 = vmatprep.subr.bf16.mxu1 %v1360_v49  ;;  %v361_v45 = vld [vmem:[#allocation5 + $0xe20] sm:$0xff]  ;;  %v1378_v48 = vpack.c.bf16 %v311_v42, %v307_v41  ;;  %v1380_v14 = vpack.c.bf16 %v330_v44, %v329_v43 }
 0x13f   :  { %v313_v49 = vld [vmem:[#allocation5 + $0x820] sm:$0xff]  ;;  %v1412_v52 = vpack.c.bf16 %v362_v46, %v361_v45 }
 0x140   :  { %v1382_v59 = vpack.c.bf16 %v314_v50, %v313_v49  ;;  %v368_v22 = vld [vmem:[#allocation5 + $0xf00] sm:$0xff] }
 0x141   :  { %1235 = vmatpush1.bf16.msra.mxu0 %v1234_v56  ;;  %1363 = vmatpush1.bf16.msra.mxu1 %v1362_v57  ;;  %v332_v56 = vld [vmem:[#allocation5 + $0xa80] sm:$0xff] }
 0x142   :  { %1237 = vmatprep.subr.bf16.mxu0 %v1236_v60  ;;  %1365 = vmatprep.subr.bf16.mxu1 %v1364_v61  ;;  %v363_v57 = vld [vmem:[#allocation5 + $0xe60] sm:$0xff]  ;;  %v1414_v60 = vpack.c.bf16 %v346_v54, %v345_v53  ;;  %v1384_v32 = vpack.c.bf16 %v332_v56, %v331_v55 }
 0x143   :  { %v315_v61 = vld [vmem:[#allocation5 + $0x860] sm:$0xff]  ;;  %v1416_v0 = vpack.c.bf16 %v364_v58, %v363_v57 }
 0x144   :  { %v1386_v7 = vpack.c.bf16 %v316_v62, %v315_v61  ;;  %v337_v31 = vld [vmem:[#allocation5 + $0xb20] sm:$0xff] }
 0x145   :  { %1239 = vmatpush1.bf16.msra.mxu0 %v1238_v4  ;;  %1367 = vmatpush1.bf16.msra.mxu1 %v1366_v5  ;;  %v334_v4 = vld [vmem:[#allocation5 + $0xac0] sm:$0xff] }
 0x146   :  { %1241 = vmatprep.subr.bf16.mxu0 %v1240_v8  ;;  %1369 = vmatprep.subr.bf16.mxu1 %v1368_v9  ;;  %v365_v5 = vld [vmem:[#allocation5 + $0xea0] sm:$0xff]  ;;  %v1418_v8 = vpack.c.bf16 %v348_v2, %v347_v1  ;;  %v1388_v11 = vpack.c.bf16 %v334_v4, %v333_v3 }
 0x147   :  { %v317_v9 = vld [vmem:[#allocation5 + $0x8a0] sm:$0xff]  ;;  %v1420_v12 = vpack.c.bf16 %v366_v6, %v365_v5 }
 0x148   :  { %v1390_v23 = vpack.c.bf16 %v318_v10, %v317_v9  ;;  %v338_v33 = vld [vmem:[#allocation5 + $0xb40] sm:$0xff] }
 0x149   :  { %1243 = vmatpush1.bf16.msra.mxu0 %v1242_v20  ;;  %1371 = vmatpush1.bf16.msra.mxu1 %v1370_v21  ;;  %v336_v20 = vld [vmem:[#allocation5 + $0xb00] sm:$0xff] }
 0x14a   :  { %1245 = vmatprep.subr.bf16.mxu0 %v1244_v25  ;;  %1373 = vmatprep.subr.bf16.mxu1 %v1372_v26  ;;  %v367_v21 = vld [vmem:[#allocation5 + $0xee0] sm:$0xff]  ;;  %v1392_v27 = vpack.c.bf16 %v336_v20, %v335_v19  ;;  %v569_v20 = vsub.s32 1, %v1618_v13 }
 0x14b   :  { %v319_v25 = vld [vmem:[#allocation5 + $0x8e0] sm:$0xff]  ;;  %v1424_v28 = vpack.c.bf16 %v368_v22, %v367_v21  ;;  %v573_v21 = vsub.s32 5, %v1618_v13 }
 0x14c   :  { %v320_v26 = vld [vmem:[#allocation5 + $0x900] sm:$0xff]  ;;  %v570_v22 = vrot.slane %v1623_v15, %v569_v20 }
 0x14d   :  { %1247 = vmatpush1.bf16.msra.mxu0 %v1246_v34  ;;  %1375 = vmatpush1.bf16.msra.mxu1 %v1374_v35  ;;  %v369_v34 = vld [vmem:[#allocation5 + $0xf20] sm:$0xff]  ;;  %v1394_v36 = vpack.c.bf16 %v320_v26, %v319_v25  ;;  %v582_v25 = vrot.slane %v1626_v17, %v573_v21 }
 0x14e   :  { %1249 = vmatprep.subr.bf16.mxu0 %v1248_v39  ;;  %1377 = vmatprep.subr.bf16.mxu1 %v1376_v40  ;;  %v370_v35 = vld [vmem:[#allocation5 + $0xf40] sm:$0xff]  ;;  %v1396_v40 = vpack.c.bf16 %v338_v33, %v337_v31  ;;  %v590_v26 = vrot.slane %v570_v22, %v569_v20 }
 0x14f   :  { %v321_v38 = vld [vmem:[#allocation5 + $0x920] sm:$0xff]  ;;  %v1428_v41 = vpack.c.bf16 %v370_v35, %v369_v34  ;;  %v602_v29 = vrot.slane %v582_v25, %v569_v20 }
 0x150   :  { %v322_v39 = vld [vmem:[#allocation5 + $0x940] sm:$0xff] }
 0x151   :  { %1251 = vmatpush1.bf16.msra.mxu0 %v1250_v47  ;;  %1379 = vmatpush1.bf16.msra.mxu1 %v1378_v48  ;;  %v353_v42 = vld [vmem:[#allocation5 + $0xd20] sm:$0xff]  ;;  %v1398_v48 = vpack.c.bf16 %v322_v39, %v321_v38 }
 0x152   :  { %1381 = vmatprep.subr.bf16.mxu0 %v1380_v14  ;;  %1413 = vmatprep.subr.bf16.mxu1 %v1412_v52  ;;  %v354_v43 = vld [vmem:[#allocation5 + $0xd40] sm:$0xff] }
 0x153   :  { %v339_v44 = vld [vmem:[#allocation5 + $0xb60] sm:$0xff]  ;;  %v1430_v49 = vpack.c.bf16 %v354_v43, %v353_v42 }
 0x154   :  { %739 = vmatmul.mubr.f32.vlgmr.msra.gmra.mrb[2].mxu0 %v565_v63  ;;  %881 = vmatmul.mubr.f32.vlgmr.msra.gmra.mrb[2].mxu1 %v565_v63  ;;  %v340_v45 = vld [vmem:[#allocation5 + $0xb80] sm:$0xff] }
 0x155   :  { %1383 = vmatpush3.bf16.msra.mxu0 %v1382_v59  ;;  %1415 = vmatpush3.bf16.msra.mxu1 %v1414_v60  ;;  %v371_v46 = vld [vmem:[#allocation5 + $0xf60] sm:$0xff]  ;;  %v1400_v14 = vpack.c.bf16 %v340_v45, %v339_v44 }
 0x156   :  { %1385 = vmatprep.subr.bf16.mxu0 %v1384_v32  ;;  %1417 = vmatprep.subr.bf16.mxu1 %v1416_v0  ;;  %v372_v47 = vld [vmem:[#allocation5 + $0xf80] sm:$0xff] }
 0x157   :  { %v323_v50 = vld [vmem:[#allocation5 + $0x960] sm:$0xff]  ;;  %v1432_v52 = vpack.c.bf16 %v372_v47, %v371_v46 }
 0x158   :  { %v324_v51 = vld [vmem:[#allocation5 + $0x980] sm:$0xff] }
 0x159   :  { %1387 = vmatpush3.bf16.msra.mxu0 %v1386_v7  ;;  %1419 = vmatpush3.bf16.msra.mxu1 %v1418_v8  ;;  %v355_v53 = vld [vmem:[#allocation5 + $0xd60] sm:$0xff]  ;;  %v1402_v59 = vpack.c.bf16 %v324_v51, %v323_v50 }
 0x15a   :  { %1389 = vmatprep.subr.bf16.mxu0 %v1388_v11  ;;  %1421 = vmatprep.subr.bf16.mxu1 %v1420_v12  ;;  %v356_v54 = vld [vmem:[#allocation5 + $0xd80] sm:$0xff] }
 0x15b   :  { %v341_v55 = vld [vmem:[#allocation5 + $0xba0] sm:$0xff]  ;;  %v1434_v60 = vpack.c.bf16 %v356_v54, %v355_v53 }
 0x15c   :  { %v342_v56 = vld [vmem:[#allocation5 + $0xbc0] sm:$0xff] }
 0x15d   :  { %1391 = vmatpush3.bf16.msra.mxu0 %v1390_v23  ;;  %1423 = vmatpush3.bf16.msra.mxu1 %v1422_v24  ;;  %v373_v57 = vld [vmem:[#allocation5 + $0xfa0] sm:$0xff]  ;;  %v1404_v61 = vpack.c.bf16 %v342_v56, %v341_v55  ;;  %v578_v23 = vrot.slane %v1626_v17, %v569_v20  ;;  %v574_v24 = vrot.slane %v1623_v15, %v573_v21  ;;  %v893_v17 = vsub.s32 2, %v1618_v13 }
 0x15e   :  { %1393 = vmatprep.subr.bf16.mxu0 %v1392_v27  ;;  %1425 = vmatprep.subr.bf16.mxu1 %v1424_v28  ;;  %v374_v58 = vld [vmem:[#allocation5 + $0xfc0] sm:$0xff] }
 0x15f   :  { %v1436_v62 = vpack.c.bf16 %v374_v58, %v373_v57  ;;  %v325_v63 = vld [vmem:[#allocation5 + $0x9a0] sm:$0xff]  ;;  %v598_v27 = vrot.slane %v578_v23, %v569_v20  ;;  %v594_v28 = vrot.slane %v574_v24, %v569_v20  ;;  %v894_v45 = vrot.slane %v1623_v15, %v893_v17 }
 0x160   :  { %v326_v32 = vld [vmem:[#allocation5 + $0x9c0] sm:$0xff] }
 0x161   :  { %1395 = vmatpush3.bf16.msra.mxu0 %v1394_v36  ;;  %1427 = vmatpush3.bf16.msra.mxu1 %v1426_v37  ;;  %v357_v0 = vld [vmem:[#allocation5 + $0xda0] sm:$0xff]  ;;  %v1406_v1 = vpack.c.bf16 %v326_v32, %v325_v63 }
 0x162   :  { %1397 = vmatprep.subr.bf16.mxu0 %v1396_v40  ;;  %1429 = vmatprep.subr.bf16.mxu1 %v1428_v41  ;;  %v358_v2 = vld [vmem:[#allocation5 + $0xdc0] sm:$0xff] }
 0x163   :  { %v1438_v3 = vpack.c.bf16 %v358_v2, %v357_v0  ;;  %v343_v4 = vld [vmem:[#allocation5 + $0xbe0] sm:$0xff] }
 0x164   :  { %v344_v5 = vld [vmem:[#allocation5 + $0xc00] sm:$0xff] }
 0x165   :  { %1399 = vmatpush3.bf16.msra.mxu0 %v1398_v48  ;;  %1431 = vmatpush3.bf16.msra.mxu1 %v1430_v49  ;;  %v375_v6 = vld [vmem:[#allocation5 + $0xfe0] sm:$0xff]  ;;  %v1408_v7 = vpack.c.bf16 %v344_v5, %v343_v4 }
 0x166   :  { %1401 = vmatprep.subr.bf16.mxu0 %v1400_v14  ;;  %1433 = vmatprep.subr.bf16.mxu1 %v1432_v52  ;;  %v376_v8 = vld [vmem:[#allocation5 + $0x1000] sm:$0xff] }
 0x167   :  { %v327_v9 = vld [vmem:[#allocation5 + $0x9e0] sm:$0xff]  ;;  %v1440_v11 = vpack.c.bf16 %v376_v8, %v375_v6 }
 0x168   :  { %v328_v10 = vld [vmem:[#allocation5 + $0xa00] sm:$0xff] }
 0x169   :  { %1403 = vmatpush3.bf16.msra.mxu0 %v1402_v59  ;;  %1435 = vmatpush3.bf16.msra.mxu1 %v1434_v60  ;;  %v1410_v12 = vpack.c.bf16 %v328_v10, %v327_v9  ;;  %v359_v16 = vld [vmem:[#allocation5 + $0xde0] sm:$0xff] }
 0x16a   :  { %1405 = vmatprep.subr.bf16.mxu0 %v1404_v61  ;;  %1437 = vmatprep.subr.bf16.mxu1 %v1436_v62  ;;  %v360_v18 = vld [vmem:[#allocation5 + $0xe00] sm:$0xff] }
 0x16b   :  { %v1442_v19 = vpack.c.bf16 %v360_v18, %v359_v16 }
 0x16d   :  { %1407 = vmatpush3.bf16.msra.mxu0 %v1406_v1  ;;  %1439 = vmatpush3.bf16.msra.mxu1 %v1438_v3 }
 0x16e   :  { %1409 = vmatprep.subr.bf16.mxu0 %v1408_v7  ;;  %1441 = vmatprep.subr.bf16.mxu1 %v1440_v11 }
 0x171   :  { %1411 = vmatpush3.bf16.msra.mxu0 %v1410_v12  ;;  %1443 = vmatpush3.bf16.msra.mxu1 %v1442_v19 }
 0x227   :  { %v740_v30 = vpop.f32.mrb[2].mxu0  ;;  %v882_v31 = vpop.f32.mrb[2].mxu1 }
 0x228   :  { %v1444_v33 = vadd.f32 %v740_v30, %v590_v26  ;;  %v1446_v34 = vadd.f32 %v882_v31, %v598_v27  ;;  %v742_v35 = vpop.f32.mrb[3].mxu0  ;;  %v884_v36 = vpop.f32.mrb[3].mxu1 }
 0x229   :  { %v1445_v37 = vadd.f32 %v742_v35, %v594_v28  ;;  %v1447_v38 = vadd.f32 %v884_v36, %v602_v29 }
 0x22a   :  { %v887_v41 = vmax.f32 %v1444_v33, 0.0  ;;  %v889_v42 = vmax.f32 %v1446_v34, 0.0 }
 0x22b   :  { %v888_v39 = vmax.f32 %v1445_v37, 0.0  ;;  %v890_v40 = vmax.f32 %v1447_v38, 0.0 }
 0x22d   :  { %959 = vmatprep.mubr.f32.mxu0 %v888_v39  ;;  %1029 = vmatprep.mubr.f32.mxu1 %v890_v40 }
 0x22e   :  { %960 = vmatmul.mubr.f32.vlgmr.msra.gmra.mrb[4].mxu0 %v887_v41  ;;  %1030 = vmatmul.mubr.f32.vlgmr.msra.gmra.mrb[4].mxu1 %v889_v42 }
 0x301   :  { %v1086_v43 = vpop.f32.mrb[4].mxu0  ;;  %v1121_v44 = vpop.f32.mrb[4].mxu1 }
 0x302   :  { %v1087_v46 = vpop.f32.mrb[5].mxu0  ;;  %v1122_v47 = vpop.f32.mrb[5].mxu1 }
 0x303   :  { %v1088_v48 = vadd.f32 %v1087_v46, %v1086_v43  ;;  %v1123_v49 = vadd.f32 %v1122_v47, %v1121_v44 }
 0x305   :  { %v962_v50 = vadd.f32 %v1088_v48, %v894_v45 }
 0x307   :  { %v1032_v51 = vadd.f32 %v1123_v49, %v962_v50 }
 0x309   :  { %1035 = vst [vmem:[#allocation8] sm:$0xff] %v1032_v51 }
 0x30a   :  { %1536 = shalt.err (!%p1533_p0)
}
 0x30b   :  { %s1537_s25 = scalar_lea.hbm %s1664_s3, 128 }
 0x30c   :  { %p1538_p1 = scmp.ne.s32.totalorder %s1664_s3, %s1537_s25  ;;  %p1541_p2 = scmp.lt.u32.totalorder %s1537_s25, %s1664_s3 }
 0x30e   :  { %p1543_p3 = pnand %p1541_p2, %p1538_p1 }
 0x310   :  { %1546 = shalt.err (!%p1543_p3)
}
 0x311   :  { %1045 = dma.vmem_to_hbm [thread:$0]  %s1043_s21, 128, %s1664_s3, [#allocation4]  }
 0x312   :  { %1551 = dma.done.wait [#allocation4], 128  }
 0x313   :  { %1552 = vsyncadd [#allocation4], 4294967168 }
 0x314   :  { %1049 = vsyncpa [#allocation3], 1 }
 0x315   :  { %1050 = vsyncpa [#allocation6], 1 }
 0x316   :  { %1051 = vsyncpa [#allocation4], 1 }

</bundles_post_ra>
